<compile_context>
chip_gen: v7x
topology: tpu7x:2x2x1
jax: 0.10.0
libtpu: 0.0.40
codegen_flags: <defaults>
</compile_context>

<pallas_src>
import jax
import jax.numpy as jnp
from jax.experimental import pallas as pl
from jax.experimental.pallas import tpu as pltpu


def unit_tcn_forward(x, conv_w, conv_b, gamma, beta, *, stride=1, eps=1e-5,
                     batch_block=None):
    """Pallas implementation of unit_tcn.forward (conv -> InstanceNorm, no ReLU)."""
    if stride != 1:
        # TODO(synk): strided temporal conv (stride>1) not implemented; module default is 1.
        raise NotImplementedError("stride != 1 not supported")

    N, C_in, T, V = x.shape
    C_out, C_in_w, K, Kw = conv_w.shape
    assert C_in_w == C_in and Kw == 1
    pad = (K - 1) // 2
    T_out = (T + 2 * pad - K) // stride + 1
    S = T_out * V
    S_pad = ((S + 127) // 128) * 128           # lane-dense spatial axis
    KC = K * C_in

    # ---- wrapper-side im2col (padding folded into the column construction) ----
    # cols[n, k*C_in + ci, t*V + v] = x_padded[n, ci, t + k, v]
    xp = jnp.pad(x, ((0, 0), (0, 0), (pad, pad), (0, 0)))
    cols = jnp.stack([xp[:, :, k:k + T_out, :] for k in range(K)], axis=1)
    cols = cols.reshape(N, KC, S)
    if S_pad != S:
        # Zero columns: they contribute 0 to the matmul and to sum/sum-of-squares,
        # so dividing the stats by S (not S_pad) keeps InstanceNorm exact.
        cols = jnp.pad(cols, ((0, 0), (0, 0), (0, S_pad - S)))

    # Weight (C_out, C_in, K, 1) -> (C_out, K*C_in), matching the k-major stacking.
    # Cast to the activation dtype so the MXU sees matching native operands.
    w2 = jnp.transpose(conv_w[:, :, :, 0], (0, 2, 1)).reshape(C_out, KC).astype(x.dtype)
    # Conv bias cancels exactly under InstanceNorm (per-channel mean subtraction).
    del conv_b
    g2 = gamma.reshape(C_out, 1).astype(jnp.float32)
    bt2 = beta.reshape(C_out, 1).astype(jnp.float32)

    # ---- pick samples-per-grid-step B ----
    if batch_block is None:
        itemsize = jnp.dtype(x.dtype).itemsize
        bytes_per_sample = (KC + C_out) * S_pad * itemsize
        target_bytes = 4 << 20                 # ~4 MiB in+out per step
        B = 1
        for cand in range(1, N + 1):
            if N % cand:
                continue
            if cand > 8 or cand * bytes_per_sample > target_bytes:
                break
            if N >= 2 and N // cand < 2:       # keep >=2 grid steps for megacore
                break
            B = cand
    else:
        B = batch_block
    assert N % B == 0
    grid = (N // B,)
    inv_s = 1.0 / float(S)

    def kernel(x_ref, w_ref, g_ref, bt_ref, o_ref):
        w = w_ref[...]                          # (C_out, KC), native dtype
        g = g_ref[...]                          # (C_out, 1) f32
        bt = bt_ref[...]                        # (C_out, 1) f32
        for b in range(B):                      # small static unroll
            # Temporal conv as one MXU matmul with f32 accumulation.
            acc = jnp.dot(w, x_ref[b], preferred_element_type=jnp.float32)  # (C_out, S_pad)
            # One-pass InstanceNorm stats (biased variance), f32 accumulator.
            s1 = jnp.sum(acc, axis=1, keepdims=True)
            s2 = jnp.sum(acc * acc, axis=1, keepdims=True)
            mu = s1 * inv_s
            var = s2 * inv_s - mu * mu
            y = (acc - mu) * jax.lax.rsqrt(var + eps)
            o_ref[b] = (y * g + bt).astype(o_ref.dtype)

    out = pl.pallas_call(
        kernel,
        out_shape=jax.ShapeDtypeStruct((N, C_out, S_pad), x.dtype),
        grid=grid,
        in_specs=[
            pl.BlockSpec((B, KC, S_pad), lambda i: (i, 0, 0)),
            pl.BlockSpec((C_out, KC), lambda i: (0, 0)),
            pl.BlockSpec((C_out, 1), lambda i: (0, 0)),
            pl.BlockSpec((C_out, 1), lambda i: (0, 0)),
        ],
        out_specs=pl.BlockSpec((B, C_out, S_pad), lambda i: (i, 0, 0)),
        compiler_params=pltpu.CompilerParams(
            dimension_semantics=("parallel",),
            # Explicit scoped-VMEM budget: roomy for v5e/v6e, safely under v7x's 64 MiB.
            vmem_limit_bytes=48 * 1024 * 1024,
        ),
    )(cols, w2, g2, bt2)

    return out[:, :, :S].reshape(N, C_out, T_out, V)


def reference_forward(x, conv_w, conv_b, gamma, beta, *, eps=1e-5):
    """Pure-JAX reference matching the PyTorch module semantics."""
    K = conv_w.shape[2]
    pad = (K - 1) // 2
    y = jax.lax.conv_general_dilated(
        x, conv_w, window_strides=(1, 1), padding=((pad, pad), (0, 0)),
        dimension_numbers=("NCHW", "OIHW", "NCHW"))
    y = y + conv_b[None, :, None, None]
    mu = y.mean(axis=(2, 3), keepdims=True)
    var = ((y - mu) ** 2).mean(axis=(2, 3), keepdims=True)
    y = (y - mu) / jnp.sqrt(var + eps)
    return y * gamma[None, :, None, None] + beta[None, :, None, None]


if __name__ == "__main__":
    # Small shapes consistent with the module: NCHW = (batch, in_channels, T, V)
    N, C_in, C_out, T, V, K = 2, 4, 8, 16, 16, 5

    key = jax.random.PRNGKey(0)
    kx, kw, kb = jax.random.split(key, 3)
    x = jax.random.normal(kx, (N, C_in, T, V), dtype=jnp.float32)

    # Parameter init mirroring the module's __init__:
    #   conv: kaiming_normal_(fan_out) -> std = sqrt(2 / (C_out * K * 1))
    #   bn (InstanceNorm2d affine): weight = 1, bias = 0
    # The conv bias is given a nonzero value here to demonstrate that dropping
    # it inside the kernel is exact (it cancels under InstanceNorm).
    fan_out = C_out * K * 1
    std = (2.0 / fan_out) ** 0.5
    conv_w = jax.random.normal(kw, (C_out, C_in, K, 1), dtype=jnp.float32) * std
    conv_b = 0.1 * jax.random.normal(kb, (C_out,), dtype=jnp.float32)
    gamma = jnp.ones((C_out,), dtype=jnp.float32)
    beta = jnp.zeros((C_out,), dtype=jnp.float32)

    out = unit_tcn_forward(x, conv_w, conv_b, gamma, beta)
    out = jax.block_until_ready(out)

    ref = reference_forward(x, conv_w, conv_b, gamma, beta)
    assert out.shape == ref.shape == (N, C_out, T, V)
    assert jnp.allclose(out, ref, atol=1e-4, rtol=1e-4), "mismatch vs reference"

    print("KERNEL_OK")
</pallas_src>

<mosaic_0001>
module attributes {stable_mosaic.version = 11 : i64} {
  func.func @kernel(%arg0: i32, %arg1: memref<1x20x256xf32, #tpu.memory_space<vmem>>, %arg2: memref<8x20xf32, #tpu.memory_space<vmem>>, %arg3: memref<8x1xf32, #tpu.memory_space<vmem>>, %arg4: memref<8x1xf32, #tpu.memory_space<vmem>>, %arg5: memref<1x8x256xf32, #tpu.memory_space<vmem>>) attributes {dimension_semantics = [#tpu.dimension_semantics<parallel>], iteration_bounds = array<i64: 2>, scalar_prefetch = 0 : i64, scratch_operands = 0 : i64, tpu.core_type = #tpu.core_type<tc>, window_params = [{transform_indices = @transform_0, window_bounds = array<i64: 1, 20, 256>}, {pipeline_mode = #tpu.pipeline_mode<synchronous>, transform_indices = @transform_1, window_bounds = array<i64: 8, 20>}, {pipeline_mode = #tpu.pipeline_mode<synchronous>, transform_indices = @transform_2, window_bounds = array<i64: 8, 1>}, {pipeline_mode = #tpu.pipeline_mode<synchronous>, transform_indices = @transform_3, window_bounds = array<i64: 8, 1>}, {transform_indices = @transform_4, window_bounds = array<i64: 1, 8, 256>}]} {
    %c0 = arith.constant 0 : index
    %c0_0 = arith.constant 0 : index
    %0 = vector.load %arg2[%c0, %c0_0] : memref<8x20xf32, #tpu.memory_space<vmem>>, vector<8x20xf32>
    %c0_1 = arith.constant 0 : index
    %c0_2 = arith.constant 0 : index
    %1 = vector.load %arg3[%c0_1, %c0_2] : memref<8x1xf32, #tpu.memory_space<vmem>>, vector<8x1xf32>
    %c0_3 = arith.constant 0 : index
    %c0_4 = arith.constant 0 : index
    %2 = vector.load %arg4[%c0_3, %c0_4] : memref<8x1xf32, #tpu.memory_space<vmem>>, vector<8x1xf32>
    %c0_5 = arith.constant 0 : index
    %c0_6 = arith.constant 0 : index
    %c0_7 = arith.constant 0 : index
    %3 = vector.load %arg1[%c0_5, %c0_6, %c0_7] : memref<1x20x256xf32, #tpu.memory_space<vmem>>, vector<1x20x256xf32>
    %4 = vector.shape_cast %3 : vector<1x20x256xf32> to vector<20x256xf32>
    %cst = arith.constant dense<0.000000e+00> : vector<8x256xf32>
    %5 = tpu.matmul %0, %4, %cst {dimension_numbers = #tpu.dot_dimension_numbers<[1], [0], [0], [1], [0, 0, 1, 1], [], []>} : vector<8x20xf32>, vector<20x256xf32>, vector<8x256xf32> -> vector<8x256xf32>
    %cst_8 = arith.constant dense<0.000000e+00> : vector<8xf32>
    %6 = vector.multi_reduction <add>, %5, %cst_8 [1] : vector<8x256xf32> to vector<8xf32>
    %7 = vector.shape_cast %6 : vector<8xf32> to vector<8x1xf32>
    %8 = arith.mulf %5, %5 : vector<8x256xf32>
    %cst_9 = arith.constant dense<0.000000e+00> : vector<8xf32>
    %9 = vector.multi_reduction <add>, %8, %cst_9 [1] : vector<8x256xf32> to vector<8xf32>
    %10 = vector.shape_cast %9 : vector<8xf32> to vector<8x1xf32>
    %cst_10 = arith.constant 3.906250e-03 : f32
    %11 = vector.broadcast %cst_10 : f32 to vector<8x1xf32>
    %12 = arith.mulf %7, %11 : vector<8x1xf32>
    %cst_11 = arith.constant 3.906250e-03 : f32
    %13 = vector.broadcast %cst_11 : f32 to vector<8x1xf32>
    %14 = arith.mulf %10, %13 : vector<8x1xf32>
    %15 = arith.mulf %12, %12 : vector<8x1xf32>
    %16 = arith.subf %14, %15 : vector<8x1xf32>
    %17 = vector.broadcast %12 : vector<8x1xf32> to vector<8x256xf32>
    %18 = arith.subf %5, %17 : vector<8x256xf32>
    %cst_12 = arith.constant 9.99999974E-6 : f32
    %19 = vector.broadcast %cst_12 : f32 to vector<8x1xf32>
    %20 = arith.addf %16, %19 : vector<8x1xf32>
    %21 = math.rsqrt %20 : vector<8x1xf32>
    %22 = vector.broadcast %21 : vector<8x1xf32> to vector<8x256xf32>
    %23 = arith.mulf %18, %22 : vector<8x256xf32>
    %24 = vector.broadcast %1 : vector<8x1xf32> to vector<8x256xf32>
    %25 = arith.mulf %23, %24 : vector<8x256xf32>
    %26 = vector.broadcast %2 : vector<8x1xf32> to vector<8x256xf32>
    %27 = arith.addf %25, %26 : vector<8x256xf32>
    %c0_13 = arith.constant 0 : index
    %c0_14 = arith.constant 0 : index
    %c0_15 = arith.constant 0 : index
    %28 = vector.load %arg5[%c0_13, %c0_14, %c0_15] : memref<1x8x256xf32, #tpu.memory_space<vmem>>, vector<1x8x256xf32>
    %29 = vector.shape_cast %28 : vector<1x8x256xf32> to vector<8x256xf32>
    %30 = vector.shape_cast %27 : vector<8x256xf32> to vector<1x8x256xf32>
    tpu.vector_store %arg5[%c0_13, %c0_14, %c0_15], %30 {strides = array<i32>} : memref<1x8x256xf32, #tpu.memory_space<vmem>>, vector<1x8x256xf32>,
    return
  }
  func.func @transform_0(%arg0: i32) -> (i32, i32, i32) {
    %c0_i32 = arith.constant 0 : i32
    %c0_i32_0 = arith.constant 0 : i32
    %c0_i32_1 = arith.constant 0 : i32
    return %arg0, %c0_i32, %c0_i32_0 : i32, i32, i32
  }
  func.func @transform_1(%arg0: i32) -> (i32, i32) {
    %c0_i32 = arith.constant 0 : i32
    %c0_i32_0 = arith.constant 0 : i32
    %c0_i32_1 = arith.constant 0 : i32
    return %c0_i32, %c0_i32_0 : i32, i32
  }
  func.func @transform_2(%arg0: i32) -> (i32, i32) {
    %c0_i32 = arith.constant 0 : i32
    %c0_i32_0 = arith.constant 0 : i32
    %c0_i32_1 = arith.constant 0 : i32
    return %c0_i32, %c0_i32_0 : i32, i32
  }
  func.func @transform_3(%arg0: i32) -> (i32, i32) {
    %c0_i32 = arith.constant 0 : i32
    %c0_i32_0 = arith.constant 0 : i32
    %c0_i32_1 = arith.constant 0 : i32
    return %c0_i32, %c0_i32_0 : i32, i32
  }
  func.func @transform_4(%arg0: i32) -> (i32, i32, i32) {
    %c0_i32 = arith.constant 0 : i32
    %c0_i32_0 = arith.constant 0 : i32
    %c0_i32_1 = arith.constant 0 : i32
    return %arg0, %c0_i32, %c0_i32_0 : i32, i32, i32
  }
}

</mosaic_0001>

<bundles_post_ra>
// kernel: tpu_custom_call.1
= control target key start
LH: loop header
LB: loop body
LE: loop exit
PB: predicated region body
PF: predicated region fallthrough
CT: control target
= control target key end

     0   :  { %9 = vsyncpa [#allocation3], 0  ;;  %s661_s0 = inlined_call_operand.vmem [shape: f32[2,20,256], index: 0, kind: input, shape index: {}]   ;;  %s662_s1 = inlined_call_operand.vmem [shape: f32[8,20], index: 1, kind: input, shape index: {}]   ;;  %s663_s2 = inlined_call_operand.vmem [shape: f32[8,1], index: 2, kind: input, shape index: {}]   ;;  %s664_s3 = inlined_call_operand.vmem [shape: f32[8,1], index: 3, kind: input, shape index: {}]   ;;  %s665_s4 = inlined_call_operand.hbm [shape: f32[2,8,256], index: 4, kind: output, shape index: {}]  }
   0x1   :  { %11 = vsyncpa [#allocation3 + $0x1], 0  ;;  %s552_s15 = smov 0   ;;  %s554_s16 = smov 0  }
   0x2   :  { %s556_s17 = smov 0   ;;  %s558_s18 = smov 0  }
   0x3 LB: > { %s573_s19 = sadd.s32 4294967295, %s522_s18   ;;  %s395_s20 = sadd.s32 4294967294, %s522_s18   ;;  %s522_s18 = sphi %s558_s18, %s671_s18   ;;  %s518_s17 = sphi %s556_s17, %s670_s17   ;;  %s514_s16 = sphi %s554_s16, %s669_s16   ;;  %s510_s15 = sphi %s552_s15, %s668_s15  }
   0x4   : > { %s577_s21 = sadd.s32 1, %s522_s18   ;;  %s113_s22 = sadd.s32 1, %s518_s17 }
   0x5   : > { %s110_s23 = ssub.s32 %s522_s18, %s577_s21  ;;  %p123_p0 = scmp.ne.s32.totalorder %s518_s17, %s514_s16 }
   0x6   : > { %p111_p1 = scmp.eq.s32.totalorder %s110_s23, 0  ;;  %p124_p2 = scmp.eq.s32.totalorder %s573_s19, 1 }
   0x7   : > { %p129_p3 = scmp.ne.s32.totalorder %s514_s16, %s510_s15  ;;  %p130_p4 = scmp.eq.s32.totalorder %s395_s20, 1 }
   0x8   : > { %s588_s24 = scalar_select %p111_p1, %s518_s17, %s113_s22  }
   0x9   : > { %p590_p5 = por %p124_p2, %p123_p0  ;;  %p594_p6 = por %p130_p4, %p129_p3 }
   0xa   : > { %p398_p7 = scmp.ge.s32.totalorder %s522_s18, 1  ;;  %p165_p8 = scmp.lt.s32.totalorder %s522_s18, 3 }
   0xc   : > { %p166_p9 = pnand %p398_p7, %p165_p8 }
   0xd   : > { %p191_p10 = scmp.lt.s32.totalorder (!%p166_p9), %s573_s19, 1  ;;  %v524_v0 = vmov (!%p166_p9), 0.0   ;;  %vm209_vm0 = vcmask (!%p166_p9), 1043456   ;;  %v196_v9 = vld [vmem:[%s662_s1] sm:$0xff] (!%p166_p9)  ;;  %vm205_vm1 = vcmask (!%p166_p9), 162816   ;;  %v525_v11 = vmov (!%p166_p9), 0  }
   0xe   : > { %169 = sbr.rel (%p166_p9) target bundleno = 433 (0x1b1), region = 36  ;;  %280 = vmatprep.mubr.f32.mxu0 (!%p166_p9), %v524_v0  ;;  %v197_v10 = vld [vmem:[%s663_s2] sm:$0xff] (!%p166_p9)  ;;  %456 = vset.pattern.permute.xlu1 (!%p166_p9), %v525_v11  ;;  %s188_s12 = sand.u32 (!%p166_p9), 1, %s514_s16  }
   0xf   : > { %457 = vset.pattern.permute.xlu0 (!%p166_p9), %v525_v11  ;;  %307 = vperm.xlu1 (!%p166_p9), %456, %v197_v10   ;;  %v198_v12 = vld [vmem:[%s664_s3] sm:$0xff] (!%p166_p9)  ;;  %s399_s13 = sshll.u32 (!%p166_p9), %s188_s12, 4  ;;  %s409_s14 = sshll.u32 (!%p166_p9), %s573_s19, 8 }
  0x10   : > { %s190_s20 = scalar_lea.vmem (!%p166_p9), [#allocation2], %s399_s13  ;;  %s526_s30 = smov (!%p166_p9), [#allocation2]  }
  0x11   : > { %s336_s22 = sshll.u32 (!%p166_p9), %s190_s20, 4  ;;  %s621_s22 = int_to_ptr.vmem [resolvable:$true] %s336_s22 }
  0x12   : > { %s460_s29 = scalar_lea.vmem (!%p166_p9), %s621_s22, 256 }
  0x13   : > { %314 = vperm.xlu1 (!%p166_p9), %456, %v198_v12   ;;  %p461_p11 = scmp.ne.s32.totalorder (!%p166_p9), %s621_s22, %s460_s29 }
  0x15   : > { %s192_s27 = scalar_select %p191_p10, %s573_s19, 1 }
  0x16   : > { %s322_s19 = scalar_lea.sflag [#allocation3], %s188_s12  ;;  %p462_p12 = pnand %p461_p11, %p590_p5 }
  0x17   : > { %s414_s28 = smul.u32 48, %s192_s27 }
  0x18   : > { %p463_p13 = pneg %p462_p12 }
  0x19   : > { %s195_s5 = scalar_lea.vmem %s661_s0, %s414_s28  ;;  %s619_s28 = scalar_lea.hbm %s665_s4, %s409_s14 }
  0x1a   : > { %v200_v1 = vld [vmem:[%s195_s5 + $0x8] sm:$0xff]  ;;  %v202_v2 = vld [vmem:[%s195_s5 + $0x18] sm:$0xff]  ;;  %v199_v3 = vld [vmem:[%s195_s5] sm:$0xff] }
  0x1b   : > { %v410_v4 = vpack.c.bf16 %v202_v2, %v200_v1  ;;  %v201_v5 = vld [vmem:[%s195_s5 + $0x10] sm:$0xff]  ;;  %v204_v7 = vld [vmem:[%s195_s5 + $0x28] sm:$0xf]  ;;  %v203_v8 = vld [vmem:[%s195_s5 + $0x20] sm:$0xf]  ;;  %s464_s5 = sshll.u32 %s526_s30, 4  ;;  %s465_s5 = int_to_ptr.vmem [resolvable:$false] %s464_s5 }
  0x1c   : > { %v412_v6 = vpack.c.bf16 %v201_v5, %v199_v3  ;;  %s466_s6 = scalar_lea.vmem %s465_s5, 512  ;;  %p467_p0 = scmp.lt.s32.totalorder %s621_s22, %s465_s5 }
  0x1d   : > { %411 = vmatprep.subr.bf16.mxu0 %v410_v4  ;;  %p468_p1 = scmp.lt.s32.totalorder %s466_s6, %s460_s29 }
  0x1e   : > { %413 = vmatpush1.bf16.msra.mxu0 %v412_v6 }
  0x1f   : > { %401 = vmatprep.subr.msk.mxu0 %vm209_vm0, %v204_v7  ;;  %p469_p2 = por %p468_p1, %p467_p0 }
  0x21   : > { %p470_p3 = pnand %p469_p2, %p463_p13 }
  0x22   : > { %402 = vmatpush1.msk.msra.mxu0 %vm209_vm0, %v203_v8 }
  0x23   : > { %403 = vmatmul.mubr.msk.f32.vlgmr.msra.gmra.mrb[0].mxu0 %vm205_vm1, %v196_v9 }
  0x8e   : > { %v308_v26 = vpop.permute.xlu1 %307 }
  0x92   : > { %v315_v34 = vpop.permute.xlu1 %314 }
  0xf6   : > { %v282_v13 = vpop.f32.mrb[0].mxu0 }
  0xf7   : > { %v284_v14 = vpop.f32.mrb[1].mxu0  ;;  %v290_v15 = vmul.f32 %v282_v13, %v282_v13 }
  0xf8   : > { %v291_v16 = vmul.f32 %v284_v14, %v284_v14  ;;  %v287_v17 = vadd.f32 %v284_v14, %v282_v13 }
  0xfa   : > { %288 = vadd.xlane.f32.xlu0 %v287_v17  ;;  %v292_v18 = vadd.f32 %v291_v16, %v290_v15 }
  0xfe   : > { %293 = vadd.xlane.f32.xlu0 %v292_v18 }
 0x187   : > { %v289_v19 = vpop.xlane.xlu0 %288 }
 0x188   : > { %v295_v20 = vmul.f32 0.00390625, %v289_v19 }
 0x18a   : > { %v297_v22 = vmul.f32 %v295_v20, %v295_v20  ;;  %v299_v27 = vsub.f32 %v282_v13, %v295_v20  ;;  %v300_v28 = vsub.f32 %v284_v14, %v295_v20 }
 0x18b   : > { %v294_v21 = vpop.xlane.xlu0 %293 }
 0x18c   : > { %v296_v23 = vmul.f32 0.00390625, %v294_v21 }
 0x18e   : > { %v298_v24 = vsub.f32 %v296_v23, %v297_v22 }
 0x190   : > { %v301_v25 = vadd.f32 1e-05, %v298_v24 }
 0x192   : > { %458 = vrsqrt.f32 %v301_v25 }
 0x19c   : > { %v459_v29 = vpop.eup %458 }
 0x19d   : > { %v303_v30 = vmul.f32 %v459_v29, %v299_v27  ;;  %v304_v31 = vmul.f32 %v459_v29, %v300_v28 }
 0x19f   : > { %v310_v32 = vmul.f32 %v308_v26, %v303_v30  ;;  %v311_v33 = vmul.f32 %v308_v26, %v304_v31 }
 0x1a1   : > { %v317_v35 = vadd.f32 %v315_v34, %v310_v32  ;;  %v318_v36 = vadd.f32 %v315_v34, %v311_v33 }
 0x1a3   : > { %319 = vst [vmem:[%s190_s20] sm:$0xff] %v317_v35  ;;  %320 = vst [vmem:[%s190_s20 + $0x8] sm:$0xff] %v318_v36 }
 0x1a4   : > { %473 = shalt.err (!%p470_p3)
}
 0x1a5   : > { %s474_s7 = scalar_lea.hbm %s619_s28, 256  ;;  %s478_s10 = scalar_lea.hbm %s665_s4, 512 }
 0x1a6   : > { %p475_p4 = scmp.ne.s32.totalorder %s619_s28, %s474_s7  ;;  %p479_p9 = scmp.lt.u32.totalorder %s619_s28, %s665_s4 }
 0x1a7   : > { %p480_p10 = scmp.lt.u32.totalorder %s478_s10, %s474_s7  ;;  %p482_p12 = scmp.lt.u32.totalorder %s474_s7, %s619_s28 }
 0x1a8   : > { %p476_p7 = pnand %p475_p4, %p590_p5 }
 0x1a9   : > { %p481_p11 = por %p480_p10, %p479_p9 }
 0x1aa   : > { %p477_p8 = pneg %p476_p7 }
 0x1ab   : > { %p483_p13 = por %p482_p12, %p481_p11 }
 0x1ad   : > { %p484_p0 = pnand %p483_p13, %p477_p8 }
 0x1af   : > { %487 = shalt.err (!%p484_p0)
}
 0x1b0   : > { %415 = dma.vmem_to_hbm [thread:$0]  (%p590_p5), %s621_s22, 256, %s619_s28, %s322_s19  }
 0x1b1 PF: > { %p421_p1 = scmp.ge.s32.totalorder %s522_s18, 2  ;;  %s348_s13 = sand.u32 1, %s510_s15  }
 0x1b2   : > { %s349_s14 = scalar_lea.sflag [#allocation3], %s348_s13 }
 0x1b3   : > { %p418_p2 = pnand %p421_p1, %p594_p6 }
 0x1b5   : > { %505 = dma.done.wait (!%p418_p2), %s349_s14, 256  }
 0x1b6   : > { %507 = vsyncadd (!%p418_p2), %s349_s14, 4294967040  ;;  %p14_p3 = scmp.ge.s32.totalorder %s577_s21, 4   ;;  %s668_s15 = smov %s514_s16 }
 0x1b7   : > { %s669_s16 = smov %s518_s17  ;;  %s670_s17 = smov %s588_s24 }
 0x1b8   : > { %s671_s18 = smov %s577_s21  ;;  %16 = sbr.rel (!%p14_p3) target bundleno = 3 (0x3), region = 71 }
 0x1bf   :  { %354 = vsyncpa [#allocation3], 1 }
 0x1c0   :  { %356 = vsyncpa [#allocation3 + $0x1], 1 }

</bundles_post_ra>
